<compile_context>
chip_gen: v7x
topology: tpu7x:2x2x1
jax: 0.10.0
libtpu: 0.0.40
codegen_flags: <defaults>
</compile_context>

<pallas_src>
import functools

import jax
import jax.numpy as jnp
from jax.experimental import pallas as pl
from jax.experimental.pallas import tpu as pltpu


# ----------------------------------------------------------------------------
# Fused kernel: read x once, pool + squeeze-excite + scale, write out once.
# ----------------------------------------------------------------------------
def _fused_ca_kernel(x_ref, w1_ref, b1_ref, w2_ref, b2_ref, o_ref, acc_ref, *,
                     inv_hw, tile):
    t = pl.program_id(1)

    @pl.when(t == 0)
    def _init():
        acc_ref[...] = jnp.zeros_like(acc_ref)

    xt = x_ref[0]                                            # (C, tile)
    # f32 accumulation of the lane reduction; the per-tile XLU reduce is
    # hidden under the input DMA (mem-bound pass).
    acc_ref[...] += jnp.sum(xt, axis=1, keepdims=True, dtype=jnp.float32)

    # Retain this tile inside the per-image output slab (VMEM traffic only,
    # no HBM cost).  `tile` is a static multiple of 128 -> aligned store.
    start = pl.multiple_of(t * tile, 128)
    o_ref[0, :, pl.ds(start, tile)] = xt

    @pl.when(t == pl.num_programs(1) - 1)
    def _finalize():
        pooled = acc_ref[...] * inv_hw                       # (C, 1) f32
        # 1x1 conv C -> C//8, bias, ReLU  (column-vector matmul, no transpose)
        h = jnp.dot(w1_ref[...], pooled,
                    preferred_element_type=jnp.float32)      # (C//8, 1)
        h = jnp.maximum(h + b1_ref[...], 0.0)
        # 1x1 conv C//8 -> C, bias, Sigmoid
        s = jnp.dot(w2_ref[...], h,
                    preferred_element_type=jnp.float32)      # (C, 1)
        s = jax.nn.sigmoid(s + b2_ref[...]).astype(o_ref.dtype)
        # Scale the retained slab in place; its writeback DMA happens when the
        # output block index (n) changes.
        o_ref[0] = o_ref[0] * s


# ----------------------------------------------------------------------------
# Two-pass fallback kernels (used when the per-image slab does not fit VMEM).
# ----------------------------------------------------------------------------
def _pool_kernel(x_ref, p_ref, acc_ref, *, inv_hw):
    t = pl.program_id(1)

    @pl.when(t == 0)
    def _init():
        acc_ref[...] = jnp.zeros_like(acc_ref)

    acc_ref[...] += jnp.sum(x_ref[0], axis=1, keepdims=True, dtype=jnp.float32)

    @pl.when(t == pl.num_programs(1) - 1)
    def _finalize():
        p_ref[0] = acc_ref[...] * inv_hw


def _scale_kernel(x_ref, s_ref, o_ref):
    # scale is already carried in x's dtype -> no per-tile cast in the hot loop
    o_ref[0] = x_ref[0] * s_ref[0]


# ----------------------------------------------------------------------------
# Helpers
# ----------------------------------------------------------------------------
def _vmem_capacity_bytes():
    # v7x: 64 MiB / TensorCore, v5e/v6e: 128 MiB.  Query the chip; fall back
    # to the smallest (v7x) if the query is unavailable.
    try:
        return int(pltpu.get_tpu_info().vmem_capacity_bytes)
    except Exception:
        return 64 << 20


def _vmem_limit(need_bytes, cap_bytes):
    lim = need_bytes * 5 // 4 + (2 << 20)
    lim = max(lim, 16 << 20)
    lim = min(lim, cap_bytes * 9 // 10)
    return int(lim)


def _pick_hw_tile(hw, c, itemsize, max_tile_bytes):
    """Largest multiple-of-128 divisor of `hw` whose (c, T) tile fits budget.

    `hw` is already padded to a multiple of 128 by the caller, so a valid
    divisor always exists (>= 128).  Note: for hw = 128 * prime this degrades
    to T = 128; acceptable, and avoided in practice by the padding quantum.
    """
    max_lanes = max(128, ((max_tile_bytes // max(c * itemsize, 1)) // 128) * 128)
    if hw <= max_lanes:
        return hw
    best = 128
    for cand in range(256, max_lanes + 1, 128):
        if hw % cand == 0:
            best = cand
    return best


# ----------------------------------------------------------------------------
# Public entry point
# ----------------------------------------------------------------------------
def ca_layer(x_nchw, w1, b1, w2, b2, *, force_two_pass=False):
    """Channel attention layer (CALayer forward).

    x_nchw: (N, C, H, W)
    w1: (C//8, C) = conv1.weight[:, :, 0, 0];  b1: (C//8,) = conv1.bias
    w2: (C, C//8) = conv2.weight[:, :, 0, 0];  b2: (C,)    = conv2.bias
    """
    N, C, H, W = x_nchw.shape
    C8 = w1.shape[0]
    HW = H * W
    dt = x_nchw.dtype
    itemsize = jnp.dtype(dt).itemsize

    # NCHW -> (N, C, HW): pure reshape of contiguous memory, no transpose.
    x = x_nchw.reshape(N, C, HW)

    # Pad the lane axis to a multiple of 128 so every tile is lane-aligned.
    # Zero padding is numerically safe (inv_hw divides by the true HW); the
    # pad / final slice only trigger when H*W % 128 != 0.
    hw_p = ((HW + 127) // 128) * 128
    if hw_p != HW:
        x = jnp.pad(x, ((0, 0), (0, 0), (0, hw_p - HW)))

    w1f = w1.astype(jnp.float32)
    w2f = w2.astype(jnp.float32)
    b1c = b1.reshape(C8, 1).astype(jnp.float32)
    b2c = b2.reshape(C, 1).astype(jnp.float32)
    w_bytes = 4 * (C8 * C + C8 + C * C8 + C)

    vmem_cap = _vmem_capacity_bytes()
    slab_bytes = C * hw_p * itemsize

    # ---------------- fused single-read path ----------------
    # VMEM need: 2x output slab (double-buffered across n) + 2x input tile
    # + weights + accumulator/slack.
    t_f = _pick_hw_tile(hw_p, C, itemsize, 1 << 20)
    fused_need = 2 * slab_bytes + 2 * C * t_f * itemsize + 4 * w_bytes + (1 << 20)
    fused_ok = (not force_two_pass) and fused_need <= int(vmem_cap * 0.70)

    if fused_ok:
        n_t = hw_p // t_f
        cost = pl.CostEstimate(
            flops=int(2 * N * C * hw_p + 2 * N * C * C8),
            transcendentals=int(N * C),
            bytes_accessed=int(2 * N * C * hw_p * itemsize),
        )
        out = pl.pallas_call(
            functools.partial(_fused_ca_kernel, inv_hw=1.0 / HW, tile=t_f),
            out_shape=jax.ShapeDtypeStruct((N, C, hw_p), dt),
            grid_spec=pltpu.PrefetchScalarGridSpec(
                num_scalar_prefetch=0,
                grid=(N, n_t),
                in_specs=[
                    pl.BlockSpec((1, C, t_f), lambda n, t: (n, 0, t)),
                    pl.BlockSpec((C8, C), lambda n, t: (0, 0)),
                    pl.BlockSpec((C8, 1), lambda n, t: (0, 0)),
                    pl.BlockSpec((C, C8), lambda n, t: (0, 0)),
                    pl.BlockSpec((C, 1), lambda n, t: (0, 0)),
                ],
                # Full-slab output block, revisited across t (accumulator-style
                # pattern) -> written back to HBM once per image.
                out_specs=pl.BlockSpec((1, C, hw_p), lambda n, t: (n, 0, 0)),
                scratch_shapes=[pltpu.VMEM((C, 1), jnp.float32)],
            ),
            compiler_params=pltpu.CompilerParams(
                dimension_semantics=("parallel", "arbitrary"),
                vmem_limit_bytes=_vmem_limit(fused_need, vmem_cap),
            ),
            cost_estimate=cost,
        )(x, w1f, b1c, w2f, b2c)
    else:
        # ---------------- two-pass fallback (x read twice) ----------------
        # Pass 1 only double-buffers the input tile -> larger tile budget.
        t1 = _pick_hw_tile(hw_p, C, itemsize, 6 << 20)
        need1 = 2 * C * t1 * itemsize + (1 << 20)
        pooled = pl.pallas_call(
            functools.partial(_pool_kernel, inv_hw=1.0 / HW),
            out_shape=jax.ShapeDtypeStruct((N, C, 1), jnp.float32),
            grid_spec=pltpu.PrefetchScalarGridSpec(
                num_scalar_prefetch=0,
                grid=(N, hw_p // t1),
                in_specs=[pl.BlockSpec((1, C, t1), lambda n, t: (n, 0, t))],
                out_specs=pl.BlockSpec((1, C, 1), lambda n, t: (n, 0, 0)),
                scratch_shapes=[pltpu.VMEM((C, 1), jnp.float32)],
            ),
            compiler_params=pltpu.CompilerParams(
                dimension_semantics=("parallel", "arbitrary"),
                vmem_limit_bytes=_vmem_limit(need1, vmem_cap),
            ),
            cost_estimate=pl.CostEstimate(
                flops=int(N * C * hw_p), transcendentals=0,
                bytes_accessed=int(N * C * hw_p * itemsize)),
        )(x)

        # Tiny squeeze-excite FC, batched over N (uses N MXU lanes instead of
        # a per-image (C,1) column matmul serialized inside the pool loop).
        p = pooled.reshape(N, C)
        h = jnp.maximum(p @ w1f.T + b1.astype(jnp.float32), 0.0)
        scale = jax.nn.sigmoid(h @ w2f.T + b2.astype(jnp.float32))
        scale = scale.astype(dt).reshape(N, C, 1)

        # Pass 2: 2 in + 2 out buffers -> smaller per-buffer budget.
        t2 = _pick_hw_tile(hw_p, C, itemsize, 3 << 20)
        need2 = 4 * C * t2 * itemsize + (1 << 20)
        out = pl.pallas_call(
            _scale_kernel,
            out_shape=jax.ShapeDtypeStruct((N, C, hw_p), dt),
            grid_spec=pltpu.PrefetchScalarGridSpec(
                num_scalar_prefetch=0,
                grid=(N, hw_p // t2),
                in_specs=[
                    pl.BlockSpec((1, C, t2), lambda n, t: (n, 0, t)),
                    pl.BlockSpec((1, C, 1), lambda n, t: (n, 0, 0)),
                ],
                out_specs=pl.BlockSpec((1, C, t2), lambda n, t: (n, 0, t)),
            ),
            compiler_params=pltpu.CompilerParams(
                dimension_semantics=("parallel", "parallel"),
                vmem_limit_bytes=_vmem_limit(need2, vmem_cap),
            ),
            cost_estimate=pl.CostEstimate(
                flops=int(N * C * hw_p), transcendentals=0,
                bytes_accessed=int(2 * N * C * hw_p * itemsize)),
        )(x, scale)

    if hw_p != HW:
        out = out[:, :, :HW]
    return out.reshape(N, C, H, W)


# ----------------------------------------------------------------------------
# Reference + self-test
# ----------------------------------------------------------------------------
def _reference(x_nchw, w1, b1, w2, b2):
    pooled = jnp.mean(x_nchw.astype(jnp.float32), axis=(2, 3))   # (N, C)
    h = jnp.maximum(pooled @ w1.T + b1, 0.0)                     # (N, C//8)
    s = jax.nn.sigmoid(h @ w2.T + b2)                            # (N, C)
    return x_nchw * s[:, :, None, None].astype(x_nchw.dtype)


if __name__ == "__main__":
    def make(N, C, H, W, key):
        C8 = C // 8
        kx, k1, k2, k3, k4 = jax.random.split(key, 5)
        x = jax.random.normal(kx, (N, C, H, W), dtype=jnp.float32)
        w1 = jax.random.normal(k1, (C8, C), dtype=jnp.float32) * 0.1
        b1 = jax.random.normal(k2, (C8,), dtype=jnp.float32) * 0.1
        w2 = jax.random.normal(k3, (C, C8), dtype=jnp.float32) * 0.1
        b2 = jax.random.normal(k4, (C,), dtype=jnp.float32) * 0.1
        return x, w1, b1, w2, b2

    k0, k1_ = jax.random.split(jax.random.PRNGKey(0), 2)

    # 1) fused single-read path (per-image slab fits VMEM).
    args = make(2, 32, 16, 16, k0)
    out = jax.block_until_ready(ca_layer(*args))
    ref = jax.block_until_ready(_reference(*args))
    assert out.shape == args[0].shape
    err = float(jnp.max(jnp.abs(out - ref)))
    assert err < 1e-5, f"fused path max abs err {err}"

    # 2) two-pass fallback path (forced), same semantics.
    out2 = jax.block_until_ready(ca_layer(*args, force_two_pass=True))
    err2 = float(jnp.max(jnp.abs(out2 - ref)))
    assert err2 < 1e-5, f"two-pass path max abs err {err2}"

    # 3) H*W not a multiple of 128 -> exercises the lane-padding path.
    args3 = make(1, 16, 10, 10, k1_)
    out3 = jax.block_until_ready(ca_layer(*args3))
    ref3 = jax.block_until_ready(_reference(*args3))
    err3 = float(jnp.max(jnp.abs(out3 - ref3)))
    assert err3 < 1e-5, f"padded path max abs err {err3}"

    print("KERNEL_OK")
</pallas_src>

<mosaic_0001>
module attributes {stable_mosaic.version = 11 : i64} {
  func.func @_fused_ca_kernel(%arg0: i32, %arg1: i32, %arg2: memref<1x32x256xf32, #tpu.memory_space<vmem>>, %arg3: memref<4x32xf32, #tpu.memory_space<vmem>>, %arg4: memref<4x1xf32, #tpu.memory_space<vmem>>, %arg5: memref<32x4xf32, #tpu.memory_space<vmem>>, %arg6: memref<32x1xf32, #tpu.memory_space<vmem>>, %arg7: memref<1x32x256xf32, #tpu.memory_space<vmem>>, %arg8: memref<32x1xf32, #tpu.memory_space<vmem>>) attributes {dimension_semantics = [#tpu.dimension_semantics<parallel>, #tpu.dimension_semantics<arbitrary>], iteration_bounds = array<i64: 2, 1>, scalar_prefetch = 0 : i64, scratch_operands = 1 : i64, tpu.core_type = #tpu.core_type<tc>, window_params = [{transform_indices = @transform_0, window_bounds = array<i64: 1, 32, 256>}, {pipeline_mode = #tpu.pipeline_mode<synchronous>, transform_indices = @transform_1, window_bounds = array<i64: 4, 32>}, {pipeline_mode = #tpu.pipeline_mode<synchronous>, transform_indices = @transform_2, window_bounds = array<i64: 4, 1>}, {pipeline_mode = #tpu.pipeline_mode<synchronous>, transform_indices = @transform_3, window_bounds = array<i64: 32, 4>}, {pipeline_mode = #tpu.pipeline_mode<synchronous>, transform_indices = @transform_4, window_bounds = array<i64: 32, 1>}, {transform_indices = @transform_5, window_bounds = array<i64: 1, 32, 256>}]} {
    %c0_i32 = arith.constant 0 : i32
    %0 = arith.cmpi eq, %arg1, %c0_i32 : i32
    %1 = arith.extui %0 : i1 to i32
    %c0_i32_0 = arith.constant 0 : i32
    %2 = arith.cmpi ne, %1, %c0_i32_0 : i32
    scf.if %2 {
      %cst_11 = arith.constant 0.000000e+00 : f32
      %19 = vector.broadcast %cst_11 : f32 to vector<32x1xf32>
      %c0_12 = arith.constant 0 : index
      %c0_13 = arith.constant 0 : index
      %20 = vector.load %arg8[%c0_12, %c0_13] : memref<32x1xf32, #tpu.memory_space<vmem>>, vector<32x1xf32>
      tpu.vector_store %arg8[%c0_12, %c0_13], %19 {strides = array<i32>} : memref<32x1xf32, #tpu.memory_space<vmem>>, vector<32x1xf32>,
    } else {
    }
    %c0 = arith.constant 0 : index
    %c0_1 = arith.constant 0 : index
    %c0_2 = arith.constant 0 : index
    %3 = vector.load %arg2[%c0, %c0_1, %c0_2] : memref<1x32x256xf32, #tpu.memory_space<vmem>>, vector<1x32x256xf32>
    %4 = vector.shape_cast %3 : vector<1x32x256xf32> to vector<32x256xf32>
    %c0_3 = arith.constant 0 : index
    %c0_4 = arith.constant 0 : index
    %5 = vector.load %arg8[%c0_3, %c0_4] : memref<32x1xf32, #tpu.memory_space<vmem>>, vector<32x1xf32>
    %cst = arith.constant dense<0.000000e+00> : vector<32xf32>
    %6 = vector.multi_reduction <add>, %4, %cst [1] : vector<32x256xf32> to vector<32xf32>
    %7 = vector.shape_cast %6 : vector<32xf32> to vector<32x1xf32>
    %8 = arith.addf %5, %7 : vector<32x1xf32>
    %c0_5 = arith.constant 0 : index
    %c0_6 = arith.constant 0 : index
    %9 = vector.load %arg8[%c0_5, %c0_6] : memref<32x1xf32, #tpu.memory_space<vmem>>, vector<32x1xf32>
    tpu.vector_store %arg8[%c0_5, %c0_6], %8 {strides = array<i32>} : memref<32x1xf32, #tpu.memory_space<vmem>>, vector<32x1xf32>,
    %c256_i32 = arith.constant 256 : i32
    %10 = arith.muli %arg1, %c256_i32 : i32
    %11 = tpu.assume_multiple %10, 128 : i32
    %c0_7 = arith.constant 0 : index
    %c0_8 = arith.constant 0 : index
    %12 = arith.index_cast %11 : i32 to index
    %13 = vector.load %arg7[%c0_7, %c0_8, %12] : memref<1x32x256xf32, #tpu.memory_space<vmem>>, vector<1x32x256xf32>
    %14 = vector.shape_cast %13 : vector<1x32x256xf32> to vector<32x256xf32>
    %15 = vector.shape_cast %4 : vector<32x256xf32> to vector<1x32x256xf32>
    tpu.vector_store %arg7[%c0_7, %c0_8, %12], %15 {strides = array<i32>} : memref<1x32x256xf32, #tpu.memory_space<vmem>>, vector<1x32x256xf32>,
    %c0_i32_9 = arith.constant 0 : i32
    %16 = arith.cmpi eq, %arg1, %c0_i32_9 : i32
    %17 = arith.extui %16 : i1 to i32
    %c0_i32_10 = arith.constant 0 : i32
    %18 = arith.cmpi ne, %17, %c0_i32_10 : i32
    scf.if %18 {
      %c0_11 = arith.constant 0 : index
      %c0_12 = arith.constant 0 : index
      %19 = vector.load %arg8[%c0_11, %c0_12] : memref<32x1xf32, #tpu.memory_space<vmem>>, vector<32x1xf32>
      %cst_13 = arith.constant 3.906250e-03 : f32
      %20 = vector.broadcast %cst_13 : f32 to vector<32x1xf32>
      %21 = arith.mulf %19, %20 : vector<32x1xf32>
      %c0_14 = arith.constant 0 : index
      %c0_15 = arith.constant 0 : index
      %22 = vector.load %arg3[%c0_14, %c0_15] : memref<4x32xf32, #tpu.memory_space<vmem>>, vector<4x32xf32>
      %cst_16 = arith.constant dense<0.000000e+00> : vector<4x1xf32>
      %23 = tpu.matmul %22, %21, %cst_16 {dimension_numbers = #tpu.dot_dimension_numbers<[1], [0], [0], [1], [0, 0, 1, 1], [], []>} : vector<4x32xf32>, vector<32x1xf32>, vector<4x1xf32> -> vector<4x1xf32>
      %c0_17 = arith.constant 0 : index
      %c0_18 = arith.constant 0 : index
      %24 = vector.load %arg4[%c0_17, %c0_18] : memref<4x1xf32, #tpu.memory_space<vmem>>, vector<4x1xf32>
      %25 = arith.addf %23, %24 : vector<4x1xf32>
      %cst_19 = arith.constant 0.000000e+00 : f32
      %26 = vector.broadcast %cst_19 : f32 to vector<4x1xf32>
      %27 = arith.maximumf %25, %26 : vector<4x1xf32>
      %c0_20 = arith.constant 0 : index
      %c0_21 = arith.constant 0 : index
      %28 = vector.load %arg5[%c0_20, %c0_21] : memref<32x4xf32, #tpu.memory_space<vmem>>, vector<32x4xf32>
      %cst_22 = arith.constant dense<0.000000e+00> : vector<32x1xf32>
      %29 = tpu.matmul %28, %27, %cst_22 {dimension_numbers = #tpu.dot_dimension_numbers<[1], [0], [0], [1], [0, 0, 1, 1], [], []>} : vector<32x4xf32>, vector<4x1xf32>, vector<32x1xf32> -> vector<32x1xf32>
      %c0_23 = arith.constant 0 : index
      %c0_24 = arith.constant 0 : index
      %30 = vector.load %arg6[%c0_23, %c0_24] : memref<32x1xf32, #tpu.memory_space<vmem>>, vector<32x1xf32>
      %31 = arith.addf %29, %30 : vector<32x1xf32>
      %32 = arith.negf %31 : vector<32x1xf32>
      %33 = math.exp %32 : vector<32x1xf32>
      %cst_25 = arith.constant 1.000000e+00 : f32
      %34 = vector.broadcast %cst_25 : f32 to vector<32x1xf32>
      %35 = arith.addf %34, %33 : vector<32x1xf32>
      %36 = arith.divf %34, %35 : vector<32x1xf32>
      %c0_26 = arith.constant 0 : index
      %c0_27 = arith.constant 0 : index
      %c0_28 = arith.constant 0 : index
      %37 = vector.load %arg7[%c0_26, %c0_27, %c0_28] : memref<1x32x256xf32, #tpu.memory_space<vmem>>, vector<1x32x256xf32>
      %38 = vector.shape_cast %37 : vector<1x32x256xf32> to vector<32x256xf32>
      %39 = vector.broadcast %36 : vector<32x1xf32> to vector<32x256xf32>
      %40 = arith.mulf %38, %39 : vector<32x256xf32>
      %c0_29 = arith.constant 0 : index
      %c0_30 = arith.constant 0 : index
      %c0_31 = arith.constant 0 : index
      %41 = vector.load %arg7[%c0_29, %c0_30, %c0_31] : memref<1x32x256xf32, #tpu.memory_space<vmem>>, vector<1x32x256xf32>
      %42 = vector.shape_cast %41 : vector<1x32x256xf32> to vector<32x256xf32>
      %43 = vector.shape_cast %40 : vector<32x256xf32> to vector<1x32x256xf32>
      tpu.vector_store %arg7[%c0_29, %c0_30, %c0_31], %43 {strides = array<i32>} : memref<1x32x256xf32, #tpu.memory_space<vmem>>, vector<1x32x256xf32>,
    } else {
    }
    return
  }
  func.func @transform_0(%arg0: i32, %arg1: i32) -> (i32, i32, i32) {
    %c0_i32 = arith.constant 0 : i32
    %c0_i32_0 = arith.constant 0 : i32
    return %arg0, %c0_i32, %arg1 : i32, i32, i32
  }
  func.func @transform_1(%arg0: i32, %arg1: i32) -> (i32, i32) {
    %c0_i32 = arith.constant 0 : i32
    %c0_i32_0 = arith.constant 0 : i32
    %c0_i32_1 = arith.constant 0 : i32
    return %c0_i32, %c0_i32_0 : i32, i32
  }
  func.func @transform_2(%arg0: i32, %arg1: i32) -> (i32, i32) {
    %c0_i32 = arith.constant 0 : i32
    %c0_i32_0 = arith.constant 0 : i32
    %c0_i32_1 = arith.constant 0 : i32
    return %c0_i32, %c0_i32_0 : i32, i32
  }
  func.func @transform_3(%arg0: i32, %arg1: i32) -> (i32, i32) {
    %c0_i32 = arith.constant 0 : i32
    %c0_i32_0 = arith.constant 0 : i32
    %c0_i32_1 = arith.constant 0 : i32
    return %c0_i32, %c0_i32_0 : i32, i32
  }
  func.func @transform_4(%arg0: i32, %arg1: i32) -> (i32, i32) {
    %c0_i32 = arith.constant 0 : i32
    %c0_i32_0 = arith.constant 0 : i32
    %c0_i32_1 = arith.constant 0 : i32
    return %c0_i32, %c0_i32_0 : i32, i32
  }
  func.func @transform_5(%arg0: i32, %arg1: i32) -> (i32, i32, i32) {
    %c0_i32 = arith.constant 0 : i32
    %c0_i32_0 = arith.constant 0 : i32
    %c0_i32_1 = arith.constant 0 : i32
    return %arg0, %c0_i32, %c0_i32_0 : i32, i32, i32
  }
}

</mosaic_0001>

<bundles_post_ra>
// kernel: tpu_custom_call.1
= control target key start
LH: loop header
LB: loop body
LE: loop exit
PB: predicated region body
PF: predicated region fallthrough
CT: control target
= control target key end

     0   :  { %10 = vsyncpa [#allocation4], 0  ;;  %s1234_s0 = inlined_call_operand.hbm [shape: f32[2,32,256], index: 0, kind: input, shape index: {}]   ;;  %s1235_s1 = inlined_call_operand.vmem [shape: f32[4,32], index: 1, kind: input, shape index: {}]   ;;  %s1236_s2 = inlined_call_operand.vmem [shape: f32[4,1], index: 2, kind: input, shape index: {}]   ;;  %s1237_s3 = inlined_call_operand.vmem [shape: f32[32,4], index: 3, kind: input, shape index: {}]   ;;  %s1238_s4 = inlined_call_operand.vmem [shape: f32[32,1], index: 4, kind: input, shape index: {}]   ;;  %s1239_s5 = inlined_call_operand.hbm [shape: f32[2,32,256], index: 5, kind: output, shape index: {}]  }
   0x1   :  { %12 = vsyncpa [#allocation4 + $0x1], 0 }
   0x2   :  { %13 = vsyncpa [#allocation5], 0 }
   0x3   :  { %15 = vsyncpa [#allocation5 + $0x1], 0  ;;  %s985_s18 = smov 0   ;;  %s987_s19 = smov 0  }
   0x4   :  { %s989_s20 = smov 0   ;;  %s991_s21 = smov 0  }
   0x5   :  { %s993_s22 = smov 0   ;;  %s995_s23 = smov 0  }
   0x6 LB: > { %s681_s24 = sadd.s32 4294967295, %s943_s23   ;;  %s682_s25 = sadd.s32 4294967294, %s943_s23   ;;  %s943_s23 = sphi %s995_s23, %s21_s23   ;;  %s939_s22 = sphi %s993_s22, %s1254_s22   ;;  %s935_s21 = sphi %s991_s21, %s1253_s21   ;;  %s931_s20 = sphi %s989_s20, %s1252_s20   ;;  %s927_s19 = sphi %s987_s19, %s1251_s19   ;;  %s923_s18 = sphi %s985_s18, %s1250_s18  }
   0x7   : > { %s33_s26 = sadd.s32 1, %s939_s22  ;;  %s42_s27 = sadd.s32 1, %s931_s20 }
   0x8   : > { %p35_p0 = scmp.ge.s32.totalorder %s33_s26, 2  ;;  %p49_p1 = scmp.ne.s32.totalorder %s931_s20, %s927_s19 }
   0x9   : > { %p50_p2 = scmp.eq.s32.totalorder %s943_s23, 0  ;;  %p55_p3 = scmp.ne.s32.totalorder %s927_s19, %s923_s18 }
   0xa   : > { %s1256_s26 = smov (%p35_p0, %s33_s26), 0  ;;  %p56_p5 = scmp.eq.s32.totalorder %s681_s24, 0 }
   0xb   : > { %p1026_p4 = por %p50_p2, %p49_p1  ;;  %s37_s29 = ssub.s32 %s939_s22, %s1256_s26 }
   0xc   : > { %p163_p6 = scmp.eq.s32.totalorder %s681_s24, 1  ;;  %p40_p7 = scmp.eq.s32.totalorder %s37_s29, 0 }
   0xd   : > { %p1032_p8 = por %p56_p5, %p55_p3  ;;  %p169_p10 = scmp.eq.s32.totalorder %s682_s25, 1 }
   0xe   : > { %p1036_p9 = por %p163_p6, %p49_p1  ;;  %p755_p13 = scmp.lt.s32.totalorder %s943_s23, 2 }
   0xf   : > { %s1041_s7 = scalar_select %p40_p7, %s931_s20, %s42_s27  }
  0x10   : > { %s1243_s6 = scalar_select %p1036_p9, 1, 0 }
  0x11   : > { %p1043_p11 = por %p169_p10, %p55_p3  ;;  %s201_s9 = sand.u32 1, %s931_s20  }
  0x12   : > { %s685_s10 = sshll.u32 %s201_s9, 6  ;;  %s706_s11 = sshll.u32 %s939_s22, 10 }
  0x13   : > { %s1244_s8 = scalar_select %p1043_p11, 1, 0 }
  0x14   : > { %s1054_s14 = scalar_lea.hbm %s1234_s0, %s706_s11  ;;  %s205_s15 = scalar_lea.vmem [#allocation3], %s685_s10 }
  0x15   : > { %s214_s16 = sshll.u32 %s205_s15, 4  ;;  %p1060_p0 = pnand %p755_p13, %p1026_p4  ;;  %s1056_s16 = int_to_ptr.vmem [resolvable:$true] %s214_s16 }
  0x16   : > { %s1065_s24 = scalar_lea.sflag [#allocation4], %s201_s9  ;;  %s831_s25 = scalar_lea.hbm %s1054_s14, 1024 }
  0x17   : > { %p832_p2 = scmp.ne.s32.totalorder %s1054_s14, %s831_s25  ;;  %p833_p3 = pneg %p1060_p0 }
  0x18   : > { %s836_s28 = scalar_lea.hbm %s1234_s0, 2048  ;;  %p837_p4 = scmp.lt.u32.totalorder %s1054_s14, %s1234_s0 }
  0x19   : > { %p834_p5 = pnand %p833_p3, %p832_p2  ;;  %p838_p7 = scmp.lt.u32.totalorder %s836_s28, %s831_s25 }
  0x1a   : > { %p840_p13 = scmp.lt.u32.totalorder %s831_s25, %s1054_s14 }
  0x1b   : > { %p835_p6 = pneg %p834_p5  ;;  %p839_p10 = por %p838_p7, %p837_p4 }
  0x1d   : > { %p841_p12 = por %p840_p13, %p839_p10 }
  0x1f   : > { %p842_p1 = pnand %p841_p12, %p835_p6 }
  0x21   : > { %845 = shalt.err (!%p842_p1)
}
  0x22   : > { %s846_s9 = scalar_lea.vmem %s1056_s16, 1024  ;;  %s945_s12 = smov [#allocation3]  }
  0x23   : > { %p847_p2 = scmp.ne.s32.totalorder %s1056_s16, %s846_s9  ;;  %s851_s13 = sshll.u32 %s945_s12, 4  ;;  %s852_s13 = int_to_ptr.vmem [resolvable:$false] %s851_s13 }
  0x24   : > { %s853_s15 = scalar_lea.vmem %s852_s13, 2048  ;;  %p854_p9 = scmp.lt.s32.totalorder %s1056_s16, %s852_s13 }
  0x25   : > { %p849_p5 = pnand %p847_p2, %p833_p3  ;;  %p855_p4 = scmp.lt.s32.totalorder %s853_s15, %s846_s9 }
  0x27   : > { %p850_p11 = pneg %p849_p5  ;;  %p856_p7 = por %p855_p4, %p854_p9 }
  0x29   : > { %p857_p10 = pnand %p856_p7, %p850_p11 }
  0x2b   : > { %860 = shalt.err (!%p857_p10)
}
  0x2c   : > { %s946_s25 = smov 256   ;;  %s947_s27 = smov 16  }
  0x2d   : > { %750 = dma.hbm_to_vmem [thread:$0]  (!%p1060_p0), %s1054_s14, 1024, %s1056_s16, %s1065_s24, %s946_s25, %s946_s25, %s947_s27  }
  0x2e   : > { %p222_p12 = scmp.lt.s32.totalorder %s943_s23, 3  ;;  %p1246_p1 = scmp.ge.s32.totalorder %s943_s23, 1 }
  0x30   : > { %p223_p3 = pnand %p1246_p1, %p222_p12 }
  0x31   : > { %s1097_s29 = sand.u32 (!%p223_p3), 1, %s927_s19  }
  0x32   : > { %226 = sbr.rel (%p223_p3) target bundleno = 841 (0x349), region = 40  ;;  %s689_s28 = sshll.u32 (!%p223_p3), %s1097_s29, 6 }
  0x33   : > { %s229_s10 = scalar_lea.sflag (!%p223_p3), [#allocation4], %s1097_s29  ;;  %s232_s11 = scalar_lea.vmem (!%p223_p3), [#allocation3], %s689_s28 }
  0x39   : > { %914 = dma.done.wait (%p1032_p8), %s229_s10, 1024  }
  0x3a   : > { %916 = vsyncadd (%p1032_p8), %s229_s10, 4294966272  ;;  %vm264_vm0 = vcmask 7168   ;;  %v948_v0 = vmov 0.0   ;;  %v1111_v1 = vld [vmem:[%s232_s11 + $0x20] sm:$0xff]  ;;  %v1113_v2 = vld [vmem:[%s232_s11 + $0x28] sm:$0xff]  ;;  %v949_v13 = vmov 0.0|0.0  }
  0x3b   : > { %267 = vst.msk [vmem:[#allocation2 + $0x10] sm:$0xff] %vm264_vm0, %v948_v0  ;;  %265 = vst.msk [vmem:[#allocation2] sm:$0xff] %vm264_vm0, %v948_v0  ;;  %v1115_v3 = vld [vmem:[%s232_s11] sm:$0xff]  ;;  %v287_v4 = vadd.f32 %v1113_v2, %v1111_v1  ;;  %v1119_v5 = vld [vmem:[%s232_s11 + $0x8] sm:$0xff]  ;;  %737 = vmatprep.subr.bf16.mxu0 %v949_v13  ;;  %vm950_vm1 = vmmov 0   ;;  %vm328_vm2 = vcmask 261120  }
  0x3c   : > { %266 = vst.msk [vmem:[#allocation2 + $0x8] sm:$0xff] %vm264_vm0, %v948_v0  ;;  %268 = vst.msk [vmem:[#allocation2 + $0x18] sm:$0xff] %vm264_vm0, %v948_v0  ;;  %v1121_v6 = vld [vmem:[%s232_s11 + $0x30] sm:$0xff]  ;;  %v1123_v7 = vld [vmem:[%s232_s11 + $0x38] sm:$0xff]  ;;  %v281_v8 = vadd.f32 %v1119_v5, %v1115_v3  ;;  %726 = vmatprep.mubr.msk.f32.mxu0 %vm950_vm1, %v948_v0  ;;  %vm411_vm3 = vcmask 31744   ;;  %vm424_vm4 = vcmask 1043456  }
  0x3d   : > { %v1127_v9 = vld [vmem:[%s232_s11 + $0x10] sm:$0xff]  ;;  %v1129_v10 = vld [vmem:[%s232_s11 + $0x18] sm:$0xff]  ;;  %288 = vadd.xlane.f32.xlu1 %v287_v4  ;;  %v290_v11 = vadd.f32 %v1123_v7, %v1121_v6  ;;  %v326_v36 = vld [vmem:[%s1235_s1] sm:$0xf]  ;;  %v951_v46 = vmov 0   ;;  %s258_s13 = scalar_lea.vmem [#allocation6], %s689_s28 }
  0x3e   : > { %282 = vadd.xlane.f32.xlu0 %v281_v8  ;;  %v284_v12 = vadd.f32 %v1129_v10, %v1127_v9  ;;  %v403_v37 = vld [vmem:[%s1237_s3] sm:$0xff]  ;;  %v404_v43 = vld [vmem:[%s1237_s3 + $0x8] sm:$0xff]  ;;  %v405_v44 = vld [vmem:[%s1237_s3 + $0x10] sm:$0xff]  ;;  %814 = vset.pattern.permute.xlu1 %v951_v46  ;;  %s707_s15 = sshll.u32 %s935_s21, 10  ;;  %s595_s25 = sshll.u32 %s258_s13, 4  ;;  %s1183_s25 = int_to_ptr.vmem [resolvable:$true] %s595_s25 }
  0x3f   : > { %731 = vmatprep.mubr.msk.f32.mxu1 %vm411_vm3, %v403_v37  ;;  %v327_v38 = vld [vmem:[%s1236_s2] sm:$0xf]  ;;  %v406_v45 = vld [vmem:[%s1237_s3 + $0x18] sm:$0xff]  ;;  %813 = vset.pattern.permute.xlu0 %v951_v46  ;;  %v408_v47 = vld [vmem:[%s1238_s4 + $0x8] sm:$0xff]  ;;  %s1181_s28 = scalar_lea.hbm %s1239_s5, %s707_s15  ;;  %s582_s21 = scalar_lea.sflag [#allocation5], %s1097_s29 }
  0x40   : > { %v407_v48 = vld [vmem:[%s1238_s4] sm:$0xff]  ;;  %v410_v53 = vld [vmem:[%s1238_s4 + $0x18] sm:$0xff]  ;;  %v409_v55 = vld [vmem:[%s1238_s4 + $0x10] sm:$0xff]  ;;  %s861_s11 = scalar_lea.vmem %s1183_s25, 1024  ;;  %p1247_p9 = scmp.ne.s32.totalorder %s1243_s6, 0 }
  0x41   : > { %291 = vadd.xlane.f32.xlu1 %v290_v11  ;;  %p862_p8 = scmp.ne.s32.totalorder %s1183_s25, %s861_s11  ;;  %s952_s30 = smov [#allocation6]  }
  0x42   : > { %285 = vadd.xlane.f32.xlu0 %v284_v12  ;;  %v279_v14 = vld [vmem:[#allocation2 + $0x10] sm:$0xff]  ;;  %v277_v15 = vld [vmem:[#allocation2] sm:$0xff]  ;;  %s865_s14 = sshll.u32 %s952_s30, 4  ;;  %s866_s14 = int_to_ptr.vmem [resolvable:$false] %s865_s14 }
  0x43   : > { %v280_v20 = vld [vmem:[#allocation2 + $0x18] sm:$0xff]  ;;  %v278_v21 = vld [vmem:[#allocation2 + $0x8] sm:$0xff]  ;;  %p863_p11 = pnand %p862_p8, %p1247_p9  ;;  %s867_s16 = scalar_lea.vmem %s866_s14, 2048 }
  0x44   : > { %p868_p6 = scmp.lt.s32.totalorder %s1183_s25, %s866_s14  ;;  %p869_p13 = scmp.lt.s32.totalorder %s867_s16, %s861_s11 }
  0x45   : > { %p864_p0 = pneg %p863_p11 }
  0x46   : > { %p870_p2 = por %p869_p13, %p868_p6 }
  0x48   : > { %p871_p5 = pnand %p870_p2, %p864_p0 }
  0xca   : > { %v289_v16 = vpop.xlane.xlu1 %288 }
  0xcb   : > { %v295_v17 = vadd.f32 %v289_v16, %v279_v14  ;;  %v283_v18 = vpop.xlane.xlu0 %282 }
  0xcc   : > { %v293_v19 = vadd.f32 %v283_v18, %v277_v15 }
  0xcd   : > { %300 = vst.msk [vmem:[#allocation2 + $0x10] sm:$0xff] %vm264_vm0, %v295_v17 }
  0xce   : > { %298 = vst.msk [vmem:[#allocation2] sm:$0xff] %vm264_vm0, %v293_v19  ;;  %v292_v22 = vpop.xlane.xlu1 %291 }
  0xcf   : > { %v296_v23 = vadd.f32 %v292_v22, %v280_v20  ;;  %v286_v24 = vpop.xlane.xlu0 %285 }
  0xd0   : > { %v294_v25 = vadd.f32 %v286_v24, %v278_v21 }
  0xd1   : > { %301 = vst.msk [vmem:[#allocation2 + $0x18] sm:$0xff] %vm264_vm0, %v296_v23 }
  0xd2   : > { %299 = vst.msk [vmem:[#allocation2 + $0x8] sm:$0xff] %vm264_vm0, %v294_v25 }
  0xd4   : > { %v320_v28 = vld [vmem:[#allocation2 + $0x10] sm:$0xff] }
  0xd5   : > { %v318_v26 = vld [vmem:[#allocation2] sm:$0xff]  ;;  %v324_v33 = vmul.f32 0.00390625, %v320_v28 }
  0xd6   : > { %v322_v30 = vmul.f32 0.00390625, %v318_v26 }
  0xd8   : > { %v321_v29 = vld [vmem:[#allocation2 + $0x18] sm:$0xff] }
  0xd9   : > { %v319_v27 = vld [vmem:[#allocation2 + $0x8] sm:$0xff]  ;;  %v325_v34 = vmul.f32 0.00390625, %v321_v29 }
  0xda   : > { %v323_v31 = vmul.f32 0.00390625, %v319_v27 }
  0xdb   : > { %v741_v35 = vpack.c.bf16 %v325_v34, %v324_v33 }
  0xdc   : > { %v738_v32 = vpack.c.bf16 %v323_v31, %v322_v30 }
  0xde   : > { %739 = vmatpush3.bf16.msra.mxu0 %v738_v32 }
  0xdf   : > { %740 = vmatprep.subr.bf16.mxu0 %v949_v13 }
  0xe2   : > { %742 = vmatpush3.bf16.msra.mxu0 %v741_v35 }
  0xe5   : > { %727 = vmatmul.mubr.msk.f32.vlgmr.msra.gmra.mrb[0].mxu0 %vm328_vm2, %v326_v36 }
 0x1b8   : > { %v398_v39 = vpop.f32.mrb[0].mxu0 }
 0x1b9   : > { %v399_v40 = vadd.f32 %v398_v39, %v327_v38  ;;  %v728_v41 = vpop.f32.mrb[1].mxu0 }
 0x1bb   : > { %v402_v42 = vmax.f32 %v399_v40, 0.0 }
 0x1bd   : > { %729 = vmatprep.subr.msk.mxu1 %vm424_vm4, %v402_v42 }
 0x1be   : > { %730 = vmatpush3.msk.msra.mxu1 %vm424_vm4, %v402_v42 }
 0x1bf   : > { %732 = vmatmul.mubr.msk.f32.vlgmr.msra.gmra.mrb[0].mxu1 %vm411_vm3, %v404_v43 }
 0x1c0   : > { %734 = vmatprep.mubr.msk.f32.mxu1 %vm411_vm3, %v405_v44 }
 0x1c3   : > { %735 = vmatmul.mubr.msk.f32.gmra.mrb[2].mxu1 %vm411_vm3, %v406_v45 }
 0x292   : > { %v733_v49 = vpop.f32.mrb[0].mxu1 }
 0x293   : > { %v500_v50 = vadd.f32 %v733_v49, %v408_v47  ;;  %v494_v51 = vpop.f32.mrb[1].mxu1 }
 0x294   : > { %v495_v52 = vadd.f32 %v494_v51, %v407_v48 }
 0x295   : > { %v698_v54 = vmul.f32 -1.442695, %v500_v50 }
 0x296   : > { %v697_v56 = vmul.f32 -1.442695, %v495_v52  ;;  %v736_v57 = vpop.f32.mrb[2].mxu1 }
 0x297   : > { %815 = vpow2.f32 %v698_v54  ;;  %v510_v58 = vadd.f32 %v736_v57, %v410_v53  ;;  %v504_v59 = vpop.f32.mrb[3].mxu1 }
 0x298   : > { %817 = vpow2.f32 %v697_v56  ;;  %v505_v60 = vadd.f32 %v504_v59, %v409_v55 }
 0x299   : > { %v700_v61 = vmul.f32 -1.442695, %v510_v58 }
 0x29a   : > { %v699_v62 = vmul.f32 -1.442695, %v505_v60 }
 0x29b   : > { %819 = vpow2.f32 %v700_v61 }
 0x29c   : > { %821 = vpow2.f32 %v699_v62 }
 0x2a1   : > { %v816_v63 = vpop.eup %815 }
 0x2a2   : > { %v818_v0 = vpop.eup %817  ;;  %v526_v4 = vadd.f32 1.0, %v816_v63 }
 0x2a3   : > { %v525_v8 = vadd.f32 1.0, %v818_v0 }
 0x2a4   : > { %823 = vrcp.f32 %v526_v4 }
 0x2a5   : > { %v820_v11 = vpop.eup %819  ;;  %825 = vrcp.f32 %v525_v8 }
 0x2a6   : > { %v822_v12 = vpop.eup %821  ;;  %v528_v14 = vadd.f32 1.0, %v820_v11 }
 0x2a7   : > { %v527_v13 = vadd.f32 1.0, %v822_v12 }
 0x2a9   : > { %827 = vrcp.f32 %v527_v13 }
 0x2aa   : > { %829 = vrcp.f32 %v528_v14 }
 0x2ae   : > { %v824_v15 = vpop.eup %823 }
 0x2af   : > { %v826_v16 = vpop.eup %825  ;;  %552 = vperm.xlu1 %814, %v824_v15  }
 0x2b0   : > { %547 = vperm.xlu0 %813, %v826_v16  }
 0x2b3   : > { %v828_v17 = vpop.eup %827 }
 0x2b4   : > { %557 = vperm.xlu1 %814, %v828_v17   ;;  %v830_v18 = vpop.eup %829 }
 0x2b8   : > { %562 = vperm.xlu1 %814, %v830_v18  }
 0x32e   : > { %v553_v19 = vpop.permute.xlu1 %552 }
 0x32f   : > { %v567_v20 = vmul.f32 %v553_v19, %v1127_v9  ;;  %v568_v21 = vmul.f32 %v553_v19, %v1129_v10  ;;  %v548_v22 = vpop.permute.xlu0 %547 }
 0x330   : > { %v565_v23 = vmul.f32 %v548_v22, %v1115_v3  ;;  %v566_v24 = vmul.f32 %v548_v22, %v1119_v5 }
 0x331   : > { %575 = vst [vmem:[%s258_s13 + $0x10] sm:$0xff] %v567_v20  ;;  %576 = vst [vmem:[%s258_s13 + $0x18] sm:$0xff] %v568_v21 }
 0x332   : > { %573 = vst [vmem:[%s258_s13] sm:$0xff] %v565_v23  ;;  %574 = vst [vmem:[%s258_s13 + $0x8] sm:$0xff] %v566_v24 }
 0x333   : > { %v558_v25 = vpop.permute.xlu1 %557 }
 0x334   : > { %v569_v26 = vmul.f32 %v558_v25, %v1111_v1  ;;  %v570_v9 = vmul.f32 %v558_v25, %v1113_v2 }
 0x336   : > { %577 = vst [vmem:[%s258_s13 + $0x20] sm:$0xff] %v569_v26  ;;  %578 = vst [vmem:[%s258_s13 + $0x28] sm:$0xff] %v570_v9 }
 0x337   : > { %v563_v3 = vpop.permute.xlu1 %562 }
 0x338   : > { %v571_v1 = vmul.f32 %v563_v3, %v1121_v6  ;;  %v572_v5 = vmul.f32 %v563_v3, %v1123_v7 }
 0x33a   : > { %579 = vst [vmem:[%s258_s13 + $0x30] sm:$0xff] %v571_v1  ;;  %580 = vst [vmem:[%s258_s13 + $0x38] sm:$0xff] %v572_v5 }
 0x33b   : > { %874 = shalt.err (!%p871_p5)
}
 0x33c   : > { %s875_s17 = scalar_lea.hbm %s1181_s28, 1024  ;;  %s879_s12 = scalar_lea.hbm %s1239_s5, 2048 }
 0x33d   : > { %p876_p4 = scmp.ne.s32.totalorder %s1181_s28, %s875_s17  ;;  %p880_p12 = scmp.lt.u32.totalorder %s1181_s28, %s1239_s5 }
 0x33e   : > { %p881_p1 = scmp.lt.u32.totalorder %s879_s12, %s875_s17  ;;  %p883_p8 = scmp.lt.u32.totalorder %s875_s17, %s1181_s28 }
 0x33f   : > { %p877_p7 = pnand %p876_p4, %p1247_p9 }
 0x340   : > { %p882_p3 = por %p881_p1, %p880_p12 }
 0x341   : > { %p878_p10 = pneg %p877_p7 }
 0x342   : > { %p884_p11 = por %p883_p8, %p882_p3 }
 0x344   : > { %p885_p0 = pnand %p884_p11, %p878_p10 }
 0x346   : > { %888 = shalt.err (!%p885_p0)
}
 0x347   : > { %s953_s27 = smov 256   ;;  %s954_s10 = smov 16  }
 0x348   : > { %745 = dma.vmem_to_hbm [thread:$0]  (%p1247_p9), %s1183_s25, 1024, %s1181_s28, %s582_s21, %s953_s27, %s953_s27, %s954_s10  }
 0x349 PF: > { %s610_s11 = sand.u32 1, %s923_s18   ;;  %p1248_p6 = scmp.ne.s32.totalorder %s1244_s8, 0 }
 0x34a   : > { %p1249_p13 = scmp.ge.s32.totalorder %s943_s23, 2  ;;  %s611_s30 = scalar_lea.sflag [#allocation5], %s610_s11 }
 0x34c   : > { %p752_p2 = pnand %p1249_p13, %p1248_p6 }
 0x34e   : > { %918 = dma.done.wait (!%p752_p2), %s611_s30, 1024  }
 0x34f   : > { %920 = vsyncadd (!%p752_p2), %s611_s30, 4294966272  ;;  %s21_s23 = sadd.s32 1, %s943_s23   ;;  %s1250_s18 = smov %s927_s19 }
 0x350   : > { %p18_p5 = scmp.ge.s32.totalorder %s21_s23, 4   ;;  %s1251_s19 = smov %s931_s20 }
 0x351   : > { %s1252_s20 = smov %s1041_s7  ;;  %s1253_s21 = smov %s939_s22 }
 0x352   : > { %s1254_s22 = smov %s1256_s26  ;;  %20 = sbr.rel (!%p18_p5) target bundleno = 6 (0x6), region = 94 }
 0x359   :  { %616 = vsyncpa [#allocation4], 1 }
 0x35a   :  { %618 = vsyncpa [#allocation4 + $0x1], 1 }
 0x35b   :  { %619 = vsyncpa [#allocation5], 1 }
 0x35c   :  { %621 = vsyncpa [#allocation5 + $0x1], 1 }

</bundles_post_ra>
